<compile_context>
chip_gen: v7x
topology: tpu7x:2x2x1
jax: 0.10.0
libtpu: 0.0.40
codegen_flags: <defaults>
</compile_context>

<pallas_src>
import jax
import jax.numpy as jnp
from jax.experimental import pallas as pl
from jax.experimental.pallas import tpu as pltpu


def _att_feats_con_kernel(i_tab, j_tab, w_tab,
                          lab_i_ref, lab_j_ref, xi_ref, xj_ref,
                          out_ref):
    c = pl.program_id(0)   # core-split axis ("parallel")
    s = pl.program_id(1)   # per-core step over upper-triangular tiles

    @pl.when(s == 0)
    def _():
        out_ref[...] = jnp.zeros_like(out_ref)

    # One long-K contraction: xj has the [noise|att] columns sign-flipped, so
    # this is  gram_feats - gram_att  for the (i, j) tile directly.
    diff = jax.lax.dot_general(
        xi_ref[...], xj_ref[...], (((1,), (1,)), ((), ())),
        preferred_element_type=jnp.float32)                  # (tile, tile) f32

    neg = lab_i_ref[...] != lab_j_ref[...]                   # (tile, tile) bool
    tile_sum = jnp.sum(jnp.where(neg, diff * diff, 0.0))     # scalar f32

    # weight: 1 = diagonal tile, 2 = off-diagonal (counts its transpose), 0 = pad
    w = w_tab[c, s].astype(jnp.float32)
    out_ref[...] += w * tile_sum        # scalar broadcast-add into (1, 8, 128)


def att_feats_con(features, att_table, labels, noise_key, *, tile=None,
                  use_bf16=True):
    """Forward pass of AttFeatsCon.

    features : (B, feat_dim) float array
    att_table: (num_classes, att_dim) float array (already globally normalized)
    labels   : (B,) integer array
    """
    B, D = features.shape
    num_classes, A = att_table.shape
    eps2 = 1e-24  # (torch F.normalize eps=1e-12)**2, applied to the squared norm

    # ---- wrapper glue, O(B*(D+2A)): normalize ONCE, build signed copy ------
    f = features.astype(jnp.float32)
    f = f * jax.lax.rsqrt(jnp.maximum(jnp.sum(f * f, 1, keepdims=True), eps2))

    att_g = jnp.take(att_table, labels, axis=0).astype(jnp.float32)    # (B, A)
    # TODO(synk): draw the noise in-kernel (pltpu.prng_seed/prng_random_bits)
    # to skip this (B, A) HBM materialization; kept in the wrapper so the pure
    # JAX reference can reproduce it exactly.
    noise = jax.random.normal(noise_key, (B, A), dtype=jnp.float32)
    inv = jax.lax.rsqrt(jnp.maximum(
        jnp.sum(noise * noise, 1, keepdims=True)
        + jnp.sum(att_g * att_g, 1, keepdims=True), eps2))
    noise_n = noise * inv
    att_n = att_g * inv

    x_pos = jnp.concatenate([f, noise_n, att_n], axis=1)       # i-role
    x_neg = jnp.concatenate([f, -noise_n, -att_n], axis=1)     # j-role (signed)
    K = D + 2 * A
    Kp = ((K + 127) // 128) * 128         # lane-align K; zero pad is a no-op
    if Kp != K:
        x_pos = jnp.pad(x_pos, ((0, 0), (0, Kp - K)))
        x_neg = jnp.pad(x_neg, ((0, 0), (0, Kp - K)))
    cdt = jnp.bfloat16 if use_bf16 else jnp.float32
    x_pos = x_pos.astype(cdt)
    x_neg = x_neg.astype(cdt)

    lab_col = labels.astype(jnp.int32).reshape(B, 1)
    lab_row = labels.astype(jnp.int32).reshape(1, B)

    # ---- tiling + triangular schedule --------------------------------------
    if tile is None:
        tile = next((t for t in (512, 256, 128) if B % t == 0), B)
    assert B % tile == 0, f"batch {B} must be divisible by tile {tile}"
    assert tile % 128 == 0 or tile == B, "tile must be a multiple of 128 or == B"

    T = B // tile
    pairs = [(i, j) for i in range(T) for j in range(i, T)]    # upper triangle
    wts = [1 if i == j else 2 for (i, j) in pairs]
    ncores = min(2, len(pairs))           # leading "parallel" axis (v7x: 2 TCs)
    steps = -(-len(pairs) // ncores)
    pad = ncores * steps - len(pairs)
    pairs += [(0, 0)] * pad               # padded steps get weight 0
    wts += [0] * pad

    i_tab = jnp.array([p[0] for p in pairs], jnp.int32).reshape(ncores, steps)
    j_tab = jnp.array([p[1] for p in pairs], jnp.int32).reshape(ncores, steps)
    w_tab = jnp.array(wts, jnp.int32).reshape(ncores, steps)

    row_i = lambda c, s, it, jt, wt: (it[c, s], 0)
    row_j = lambda c, s, it, jt, wt: (jt[c, s], 0)

    itemsize = 2 if use_bf16 else 4
    n_steps = ncores * steps
    cost = pl.CostEstimate(
        flops=n_steps * (2 * tile * tile * Kp + 6 * tile * tile),
        transcendentals=0,
        bytes_accessed=n_steps * (2 * tile * Kp * itemsize + 2 * tile * 4)
                       + ncores * 8 * 128 * 4,
    )

    out = pl.pallas_call(
        _att_feats_con_kernel,
        out_shape=jax.ShapeDtypeStruct((ncores, 8, 128), jnp.float32),
        grid_spec=pltpu.PrefetchScalarGridSpec(
            num_scalar_prefetch=3,
            grid=(ncores, steps),
            in_specs=[
                pl.BlockSpec((tile, 1), row_i),                     # labels, i
                pl.BlockSpec((1, tile),
                             lambda c, s, it, jt, wt: (0, jt[c, s])),  # labels, j
                pl.BlockSpec((tile, Kp), row_i),                    # X, i-role
                # TODO(synk): add pipeline_mode=pl.Buffered(3) on this j-role
                # stream if a profile shows exposed DMA (it changes every step
                # while the i-role block stays resident).
                pl.BlockSpec((tile, Kp), row_j),                    # X signed, j
            ],
            out_specs=pl.BlockSpec((1, 8, 128),
                                   lambda c, s, it, jt, wt: (c, 0, 0)),
        ),
        compiler_params=pltpu.CompilerParams(
            dimension_semantics=("parallel", "arbitrary"),
            vmem_limit_bytes=48 * 1024 * 1024,
        ),
        cost_estimate=cost,
    )(i_tab, j_tab, w_tab, lab_col, lab_row, x_pos, x_neg)

    num = jnp.sum(out[:, 0, 0])           # one partial per core

    # den = #negative pairs = B^2 - sum_c count_c^2, exact, from labels only.
    counts = jnp.bincount(labels.astype(jnp.int32), length=num_classes)
    den = (B * B - jnp.sum(counts * counts)).astype(jnp.float32)

    # Same +1e-6 guard on the negative-pair count as the reference.
    return num / (den + 1e-6)


if __name__ == "__main__":
    key = jax.random.PRNGKey(0)
    k_feat, k_att, k_lab, k_noise = jax.random.split(key, 4)

    B, FEAT_DIM = 256, 128
    NUM_CLASSES, ATT_DIM = 16, 64

    features = jax.random.normal(k_feat, (B, FEAT_DIM), jnp.float32)
    labels = jax.random.randint(k_lab, (B,), 0, NUM_CLASSES, dtype=jnp.int32)

    # Synthetic stand-in for np.load('fasttext.npy'), normalized by its matrix
    # 2-norm (largest singular value), matching `att /= LA.norm(att, 2)`.
    att_table = jax.random.normal(k_att, (NUM_CLASSES, ATT_DIM), jnp.float32)
    att_table = att_table / jnp.linalg.norm(att_table, ord=2)

    # tile=128 -> T=2 block rows -> 3 upper-triangular tiles split across the
    # 2-entry core axis (exercises symmetry weighting, padding, per-core partials).
    loss = att_feats_con(features, att_table, labels, k_noise, tile=128)
    loss = jax.block_until_ready(loss)

    # Pure-JAX f32 reference (same noise key -> identical noise draw).
    att_g = jnp.take(att_table, labels, axis=0)
    noise = jax.random.normal(k_noise, (B, ATT_DIM), dtype=jnp.float32)
    cat = jnp.concatenate([noise, att_g], axis=1)
    f_n = features / jnp.maximum(
        jnp.linalg.norm(features, axis=1, keepdims=True), 1e-12)
    a_n = cat / jnp.maximum(jnp.linalg.norm(cat, axis=1, keepdims=True), 1e-12)
    gram_f = f_n @ f_n.T
    gram_a = a_n @ a_n.T
    mask_neg = jnp.where(labels[:, None] == labels[None, :], 0.0, 1.0)
    d = gram_f - gram_a
    ref = jnp.sum(d * d * mask_neg) / (jnp.sum(mask_neg) + 1e-6)

    assert loss.shape == () and bool(jnp.isfinite(loss))
    assert abs(float(loss) - float(ref)) <= 0.05 * abs(float(ref)) + 1e-4, (
        float(loss), float(ref))
    print("KERNEL_OK")
</pallas_src>

<mosaic_0001>
module attributes {stable_mosaic.version = 11 : i64} {
  func.func @_att_feats_con_kernel(%arg0: i32, %arg1: i32, %arg2: memref<2x2xi32, #tpu.memory_space<smem>>, %arg3: memref<2x2xi32, #tpu.memory_space<smem>>, %arg4: memref<2x2xi32, #tpu.memory_space<smem>>, %arg5: memref<128x1xi32, #tpu.memory_space<vmem>>, %arg6: memref<1x128xi32, #tpu.memory_space<vmem>>, %arg7: memref<128x256xbf16, #tpu.memory_space<vmem>>, %arg8: memref<128x256xbf16, #tpu.memory_space<vmem>>, %arg9: memref<1x8x128xf32, #tpu.memory_space<vmem>>) attributes {dimension_semantics = [#tpu.dimension_semantics<parallel>, #tpu.dimension_semantics<arbitrary>], iteration_bounds = array<i64: 2, 2>, scalar_prefetch = 3 : i64, scratch_operands = 0 : i64, tpu.core_type = #tpu.core_type<tc>, window_params = [{transform_indices = @transform_0, window_bounds = array<i64: 128, 1>}, {transform_indices = @transform_1, window_bounds = array<i64: 1, 128>}, {transform_indices = @transform_2, window_bounds = array<i64: 128, 256>}, {transform_indices = @transform_3, window_bounds = array<i64: 128, 256>}, {transform_indices = @transform_4, window_bounds = array<i64: 1, 8, 128>}]} {
    %c0_i32 = arith.constant 0 : i32
    %0 = arith.cmpi eq, %arg1, %c0_i32 : i32
    %1 = arith.extui %0 : i1 to i32
    %c0_i32_0 = arith.constant 0 : i32
    %2 = arith.cmpi ne, %1, %c0_i32_0 : i32
    scf.if %2 {
      %cst_16 = arith.constant 0.000000e+00 : f32
      %27 = vector.broadcast %cst_16 : f32 to vector<1x8x128xf32>
      %c0_17 = arith.constant 0 : index
      %c0_18 = arith.constant 0 : index
      %c0_19 = arith.constant 0 : index
      %28 = vector.load %arg9[%c0_17, %c0_18, %c0_19] : memref<1x8x128xf32, #tpu.memory_space<vmem>>, vector<1x8x128xf32>
      tpu.vector_store %arg9[%c0_17, %c0_18, %c0_19], %27 {strides = array<i32>} : memref<1x8x128xf32, #tpu.memory_space<vmem>>, vector<1x8x128xf32>,
    } else {
    }
    %c0 = arith.constant 0 : index
    %c0_1 = arith.constant 0 : index
    %3 = vector.load %arg7[%c0, %c0_1] : memref<128x256xbf16, #tpu.memory_space<vmem>>, vector<128x256xbf16>
    %c0_2 = arith.constant 0 : index
    %c0_3 = arith.constant 0 : index
    %4 = vector.load %arg8[%c0_2, %c0_3] : memref<128x256xbf16, #tpu.memory_space<vmem>>, vector<128x256xbf16>
    %cst = arith.constant dense<0.000000e+00> : vector<128x128xf32>
    %5 = tpu.matmul %3, %4, %cst {dimension_numbers = #tpu.dot_dimension_numbers<[1], [1], [0], [0], [0, 0, 1, 0], [], []>} : vector<128x256xbf16>, vector<128x256xbf16>, vector<128x128xf32> -> vector<128x128xf32>
    %c0_4 = arith.constant 0 : index
    %c0_5 = arith.constant 0 : index
    %6 = vector.load %arg5[%c0_4, %c0_5] : memref<128x1xi32, #tpu.memory_space<vmem>>, vector<128x1xi32>
    %c0_6 = arith.constant 0 : index
    %c0_7 = arith.constant 0 : index
    %7 = vector.load %arg6[%c0_6, %c0_7] : memref<1x128xi32, #tpu.memory_space<vmem>>, vector<1x128xi32>
    %8 = vector.broadcast %6 : vector<128x1xi32> to vector<128x128xi32>
    %9 = vector.broadcast %7 : vector<1x128xi32> to vector<128x128xi32>
    %10 = arith.cmpi ne, %8, %9 : vector<128x128xi32>
    %11 = arith.mulf %5, %5 : vector<128x128xf32>
    %cst_8 = arith.constant 0.000000e+00 : f32
    %12 = vector.broadcast %cst_8 : f32 to vector<128x128xf32>
    %13 = arith.select %10, %11, %12 : vector<128x128xi1>, vector<128x128xf32>
    %14 = vector.shape_cast %13 : vector<128x128xf32> to vector<1x128x128xf32>
    %cst_9 = arith.constant dense<0.000000e+00> : vector<1xf32>
    %15 = vector.multi_reduction <add>, %14, %cst_9 [1, 2] : vector<1x128x128xf32> to vector<1xf32>
    %16 = vector.shape_cast %15 : vector<1xf32> to vector<1x1x1xf32>
    %17 = vector.extract %16[0, 0, 0] : f32 from vector<1x1x1xf32>
    %18 = arith.index_cast %arg0 : i32 to index
    %19 = arith.index_cast %arg1 : i32 to index
    %20 = memref.load %arg4[%18, %19] : memref<2x2xi32, #tpu.memory_space<smem>>
    %21 = arith.sitofp %20 : i32 to f32
    %c0_10 = arith.constant 0 : index
    %c0_11 = arith.constant 0 : index
    %c0_12 = arith.constant 0 : index
    %22 = vector.load %arg9[%c0_10, %c0_11, %c0_12] : memref<1x8x128xf32, #tpu.memory_space<vmem>>, vector<1x8x128xf32>
    %23 = arith.mulf %21, %17 : f32
    %24 = vector.broadcast %23 : f32 to vector<1x8x128xf32>
    %25 = arith.addf %22, %24 : vector<1x8x128xf32>
    %c0_13 = arith.constant 0 : index
    %c0_14 = arith.constant 0 : index
    %c0_15 = arith.constant 0 : index
    %26 = vector.load %arg9[%c0_13, %c0_14, %c0_15] : memref<1x8x128xf32, #tpu.memory_space<vmem>>, vector<1x8x128xf32>
    tpu.vector_store %arg9[%c0_13, %c0_14, %c0_15], %25 {strides = array<i32>} : memref<1x8x128xf32, #tpu.memory_space<vmem>>, vector<1x8x128xf32>,
    return
  }
  func.func @transform_0(%arg0: i32, %arg1: i32, %arg2: memref<2x2xi32, #tpu.memory_space<smem>>, %arg3: memref<2x2xi32, #tpu.memory_space<smem>>, %arg4: memref<2x2xi32, #tpu.memory_space<smem>>) -> (i32, i32) {
    %0 = arith.index_cast %arg0 : i32 to index
    %1 = arith.index_cast %arg1 : i32 to index
    %2 = memref.load %arg2[%0, %1] : memref<2x2xi32, #tpu.memory_space<smem>>
    %c0_i32 = arith.constant 0 : i32
    %c0_i32_0 = arith.constant 0 : i32
    return %2, %c0_i32 : i32, i32
  }
  func.func @transform_1(%arg0: i32, %arg1: i32, %arg2: memref<2x2xi32, #tpu.memory_space<smem>>, %arg3: memref<2x2xi32, #tpu.memory_space<smem>>, %arg4: memref<2x2xi32, #tpu.memory_space<smem>>) -> (i32, i32) {
    %0 = arith.index_cast %arg0 : i32 to index
    %1 = arith.index_cast %arg1 : i32 to index
    %2 = memref.load %arg3[%0, %1] : memref<2x2xi32, #tpu.memory_space<smem>>
    %c0_i32 = arith.constant 0 : i32
    %c0_i32_0 = arith.constant 0 : i32
    return %c0_i32, %2 : i32, i32
  }
  func.func @transform_2(%arg0: i32, %arg1: i32, %arg2: memref<2x2xi32, #tpu.memory_space<smem>>, %arg3: memref<2x2xi32, #tpu.memory_space<smem>>, %arg4: memref<2x2xi32, #tpu.memory_space<smem>>) -> (i32, i32) {
    %0 = arith.index_cast %arg0 : i32 to index
    %1 = arith.index_cast %arg1 : i32 to index
    %2 = memref.load %arg2[%0, %1] : memref<2x2xi32, #tpu.memory_space<smem>>
    %c0_i32 = arith.constant 0 : i32
    %c0_i32_0 = arith.constant 0 : i32
    return %2, %c0_i32 : i32, i32
  }
  func.func @transform_3(%arg0: i32, %arg1: i32, %arg2: memref<2x2xi32, #tpu.memory_space<smem>>, %arg3: memref<2x2xi32, #tpu.memory_space<smem>>, %arg4: memref<2x2xi32, #tpu.memory_space<smem>>) -> (i32, i32) {
    %0 = arith.index_cast %arg0 : i32 to index
    %1 = arith.index_cast %arg1 : i32 to index
    %2 = memref.load %arg3[%0, %1] : memref<2x2xi32, #tpu.memory_space<smem>>
    %c0_i32 = arith.constant 0 : i32
    %c0_i32_0 = arith.constant 0 : i32
    return %2, %c0_i32 : i32, i32
  }
  func.func @transform_4(%arg0: i32, %arg1: i32, %arg2: memref<2x2xi32, #tpu.memory_space<smem>>, %arg3: memref<2x2xi32, #tpu.memory_space<smem>>, %arg4: memref<2x2xi32, #tpu.memory_space<smem>>) -> (i32, i32, i32) {
    %c0_i32 = arith.constant 0 : i32
    %c0_i32_0 = arith.constant 0 : i32
    %c0_i32_1 = arith.constant 0 : i32
    return %arg0, %c0_i32, %c0_i32_0 : i32, i32, i32
  }
}

</mosaic_0001>

<bundles_post_ra>
// kernel: tpu_custom_call.1
= control target key start
LH: loop header
LB: loop body
LE: loop exit
PB: predicated region body
PF: predicated region fallthrough
CT: control target
= control target key end

     0   :  { %s1938_s0 = inlined_call_operand.vmem [shape: s32[2,2], index: 0, kind: input, shape index: {}]   ;;  %s1939_s3 = inlined_call_operand.vmem [shape: s32[256,1], index: 3, kind: input, shape index: {}]   ;;  %s1940_s4 = inlined_call_operand.vmem [shape: s32[1,256], index: 4, kind: input, shape index: {}]   ;;  %s1941_s5 = inlined_call_operand.vmem [shape: bf16[256,256], index: 5, kind: input, shape index: {}]   ;;  %s1942_s6 = inlined_call_operand.hbm [shape: bf16[256,256], index: 6, kind: input, shape index: {}]   ;;  %s1943_s7 = inlined_call_operand.hbm [shape: f32[2,8,128], index: 7, kind: output, shape index: {}]   ;;  %s1944_s1 = inlined_call_operand.vmem [shape: s32[2,2], index: 1, kind: input, shape index: {}]   ;;  %s1945_s2 = inlined_call_operand.vmem [shape: s32[2,2], index: 2, kind: input, shape index: {}]  }
   0x1   :  { %1955 = sst [smem:[#allocation22_spill]] %s1942_s6  ;;  %s12_s26 = sshll.u32 %s1938_s0, 4  ;;  %s13_s26 = int_to_ptr.vmem [resolvable:$true] %s12_s26 }
   0x2   :  { %s16_s29 = sshll.u32 %s1944_s1, 4  ;;  %s1337_s30 = scalar_lea.vmem %s13_s26, 32  ;;  %s17_s29 = int_to_ptr.vmem [resolvable:$true] %s16_s29 }
   0x3   :  { %p1338_p0 = scmp.ne.s32.totalorder %s13_s26, %s1337_s30  ;;  %p1342_p1 = scmp.lt.s32.totalorder %s13_s26, %s13_s26 }
   0x4   :  { %p1343_p2 = scmp.lt.s32.totalorder %s1337_s30, %s1337_s30 }
   0x6   :  { %p1344_p3 = por %p1343_p2, %p1342_p1 }
   0x8   :  { %p1345_p4 = pnand %p1344_p3, %p1338_p0 }
   0xa   :  { %1348 = shalt.err (!%p1345_p4)  }
   0xb   :  { %s1529_s8 = smov [#allocation3]   ;;  %s1349_s9 = scalar_lea.vmem %s17_s29, 32 }
   0xc   :  { %15 = dma.vmem_to_smem %s13_s26, 32, %s1529_s8, [#allocation2] }
   0xd   :  { %p1350_p5 = scmp.ne.s32.totalorder %s17_s29, %s1349_s9  ;;  %p1354_p6 = scmp.lt.s32.totalorder %s17_s29, %s17_s29 }
   0xe   :  { %p1355_p7 = scmp.lt.s32.totalorder %s1349_s9, %s1349_s9 }
  0x10   :  { %p1356_p8 = por %p1355_p7, %p1354_p6 }
  0x12   :  { %p1357_p9 = pnand %p1356_p8, %p1350_p5 }
  0x14   :  { %1360 = shalt.err (!%p1357_p9)  }
  0x15   :  { %s1530_s0 = smov [#allocation4]   ;;  %s20_s11 = sshll.u32 %s1945_s2, 4  ;;  %s21_s11 = int_to_ptr.vmem [resolvable:$true] %s20_s11 }
  0x16   :  { %19 = dma.vmem_to_smem %s17_s29, 32, %s1530_s0, [#allocation2] }
  0x17   :  { %s1361_s12 = scalar_lea.vmem %s21_s11, 32  ;;  %p1366_p11 = scmp.lt.s32.totalorder %s21_s11, %s21_s11 }
  0x18   :  { %p1362_p10 = scmp.ne.s32.totalorder %s21_s11, %s1361_s12  ;;  %p1367_p12 = scmp.lt.s32.totalorder %s1361_s12, %s1361_s12 }
  0x1a   :  { %p1368_p13 = por %p1367_p12, %p1366_p11 }
  0x1c   :  { %p1369_p0 = pnand %p1368_p13, %p1362_p10 }
  0x1e   :  { %1372 = shalt.err (!%p1369_p0)  }
  0x1f   :  { %s1531_s13 = smov [#allocation5]  }
  0x20   :  { %23 = dma.vmem_to_smem %s21_s11, 32, %s1531_s13, [#allocation2] }
  0x21   :  { %1475 = dma.done.wait [#allocation2], 96 }
  0x22   :  { %1476 = vsyncadd [#allocation2], 4294967200 }
  0x23   :  { %25 = sfence }
  0x24   :  { %26 = vsyncpa [#allocation7], 0 }
  0x25   :  { %28 = vsyncpa [#allocation7 + $0x1], 0 }
  0x26   :  { %29 = vsyncpa [#allocation8], 0 }
  0x27   :  { %31 = vsyncpa [#allocation8 + $0x1], 0  ;;  %s1587_s14 = smov 0   ;;  %s1589_s2 = smov 0  }
  0x28   :  { %s1591_s15 = smov 0   ;;  %s1593_s16 = smov 0  }
  0x29   :  { %s1595_s17 = smov 0   ;;  %s1597_s18 = smov 0  }
  0x2a   :  { %s1599_s19 = smov 0   ;;  %s1601_s20 = smov 0  }
  0x2b   :  { %s1603_s21 = smov 0   ;;  %s1605_s22 = smov 0  }
  0x2c   :  { %s1607_s23 = smov 0  }
  0x2d LB: > { %1956 = sst [smem:[#allocation15_spill]] %s1503_s17  ;;  %s1086_s24 = sadd.s32 4294967295, %s1527_s23   ;;  %s1527_s23 = sphi %s1607_s23, %s37_s23   ;;  %s1523_s22 = sphi %s1605_s22, %s1981_s22   ;;  %s1519_s21 = sphi %s1603_s21, %s1980_s21   ;;  %s1515_s20 = sphi %s1601_s20, %s1979_s20   ;;  %s1511_s19 = sphi %s1599_s19, %s1978_s19   ;;  %s1507_s18 = sphi %s1597_s18, %s1977_s18   ;;  %s1503_s17 = sphi %s1595_s17, %s1976_s17   ;;  %s1499_s16 = sphi %s1593_s16, %s1985_s16   ;;  %s1495_s15 = sphi %s1591_s15, %s1984_s15   ;;  %s1491_s2 = sphi %s1589_s2, %s1983_s2   ;;  %s1487_s14 = sphi %s1587_s14, %s1982_s14  }
  0x2e   : > { %1957 = sst [smem:[#allocation16_spill]] %s1507_s18  ;;  %s46_s26 = sadd.s32 1, %s1519_s21 }
  0x2f   : > { %1958 = sst [smem:[#allocation17_spill]] %s1519_s21  ;;  %s49_s27 = sadd.s32 1, %s1523_s22 }
  0x30   : > { %1959 = sst [smem:[#allocation18_spill]] %s1523_s22  ;;  %p47_p1 = scmp.ge.s32.totalorder %s46_s26, 2 }
  0x31   : > { %s179_s28 = sshra.s32 %s1519_s21, 7  ;;  %s184_s30 = sand.u32 127, %s1519_s21 }
  0x32   : > { %s181_s29 = sadd.s32 %s1523_s22, %s179_s28  ;;  %s1987_s26 = smov (%p47_p1, %s46_s26), 0 }
  0x33   : > { %1960 = sst [smem:[#allocation19_spill]] %s1987_s26  ;;  %s1989_s27 = smov (!%p47_p1, %s49_s27), %s1523_s22 }
  0x34   : > { %s1094_s8 = sshll.u32 %s181_s29, 7  ;;  %s187_s9 = sshra.s32 %s1987_s26, 7 }
  0x35   : > { %p51_p2 = scmp.ge.s32.totalorder %s1989_s27, 2  ;;  %s1653_s0 = sadd.s32 %s1094_s8, %s184_s30 }
  0x36   : > { %s186_s1 = sld [smem:[#allocation4 + %s1653_s0]]  ;;  %s192_s10 = sand.u32 127, %s1987_s26 }
  0x37   : > { %s1991_s27 = smov (%p51_p2, %s1989_s27), 0  ;;  %s198_s11 = sadd.s32 1, %s1507_s18 }
  0x38   : > { %1961 = sst [smem:[#allocation20_spill]] %s1991_s27  ;;  %p205_p3 = scmp.ne.s32.totalorder %s1507_s18, %s1503_s17 }
  0x39   : > { %s189_s12 = sadd.s32 %s187_s9, %s1991_s27  ;;  %p206_p4 = scmp.eq.s32.totalorder %s1527_s23, 0 }
  0x3a   : > { %s1095_s13 = sshll.u32 %s189_s12, 7  ;;  %p211_p5 = scmp.ne.s32.totalorder %s1503_s17, %s1499_s16 }
  0x3b   : > { %s193_s28 = sadd.s32 %s1095_s13, %s192_s10  ;;  %p1666_p6 = por %p206_p4, %p205_p3 }
  0x3c   : > { %s194_s30 = sld [smem:[#allocation4 + %s193_s28]]  ;;  %p212_p7 = scmp.eq.s32.totalorder %s1086_s24, 0 }
  0x3d   : > { %s221_s8 = ssub.s32 %s1523_s22, %s1991_s27  ;;  %s224_s9 = sadd.s32 1, %s1495_s15 }
  0x3e   : > { %p1675_p8 = por %p212_p7, %p211_p5  ;;  %p222_p9 = scmp.eq.s32.totalorder %s221_s8, 0 }
  0x3f   : > { %p234_p10 = scmp.ne.s32.totalorder %s1495_s15, %s1491_s2  ;;  %p235_p11 = scmp.eq.s32.totalorder %s1086_s24, 3 }
  0x40   : > { %s1963_s25 = scalar_select %p1675_p8, 1, 0 }
  0x41   : > { %s1684_s16 = scalar_select %p222_p9, %s1495_s15, %s224_s9  }
  0x42   : > { %p1686_p12 = por %p235_p11, %p234_p10  ;;  %p240_p13 = scmp.ne.s32.totalorder %s1491_s2, %s1487_s14 }
  0x43   : > { %s195_s12 = ssub.s32 %s186_s1, %s194_s30  ;;  %s1965_s13 = sadd.s32 4294967294, %s1527_s23  }
  0x44   : > { %s1964_s10 = scalar_select %p1686_p12, 1, 0 }
  0x45   : > { %p241_p0 = scmp.eq.s32.totalorder %s1965_s13, 3  ;;  %p196_p1 = scmp.eq.s32.totalorder %s195_s12, 0 }
  0x46   : > { %p1190_p3 = scmp.lt.s32.totalorder %s1527_s23, 4  ;;  %s334_s24 = sand.u32 1, %s1507_s18  }
  0x47   : > { %p1694_p2 = por %p241_p0, %p240_p13  ;;  %s1098_s27 = sshll.u32 %s334_s24, 7 }
  0x48   : > { %s1700_s8 = scalar_select %p196_p1, %s1507_s18, %s198_s11  }
  0x49   : > { %s1966_s28 = scalar_select %p1694_p2, 1, 0 }
  0x4a   : > { %1967 = sst [smem:[#allocation21_spill]] %s1700_s8  ;;  %p1705_p4 = pnand %p1190_p3, %p1666_p6 }
  0x4b   : > { %s1174_s1 = scalar_select %p1666_p6, [#allocation4], [#allocation10] }
  0x4c   : > { %s1993_s0 = smov (!%p1666_p6, %s1653_s0), 0  ;;  %p1103_p5 = scmp.ge.s32.totalorder %s1527_s23, 1 }
  0x4d   : > { %s1995_s1 = smov (!%p1190_p3, %s1174_s1), [#allocation11]  ;;  %s1997_s0 = smov (!%p1190_p3, %s1993_s0), 0 }
  0x4e   : > { %s346_s30 = sld [smem:[%s1995_s1 + %s1997_s0]]  ;;  %s338_s12 = scalar_lea.vmem [#allocation6], %s1098_s27 }
  0x4f   : > { %s354_s11 = sshll.u32 %s338_s12, 4  ;;  %p362_p7 = scmp.lt.s32.totalorder %s1527_s23, 5  ;;  %s1720_s11 = int_to_ptr.vmem [resolvable:$true] %s354_s11 }
  0x50   : > { %s1970_s6 = sld [smem:[#allocation22_spill]]  ;;  %s1727_s0 = scalar_lea.sflag [#allocation7], %s334_s24 }
  0x51   : > { %p1716_p9 = pnand %p1103_p5, %p362_p7  ;;  %p1375_p10 = pneg %p1705_p4 }
  0x54   : > { %s1154_s26 = sshll.u32 %s346_s30, 11 }
  0x56   : > { %s1725_s29 = scalar_lea.hbm %s1970_s6, %s1154_s26  ;;  %s1378_s21 = scalar_lea.hbm %s1970_s6, 4096 }
  0x57   : > { %s1373_s27 = scalar_lea.hbm %s1725_s29, 2048  ;;  %p1379_p0 = scmp.lt.u32.totalorder %s1725_s29, %s1970_s6 }
  0x58   : > { %p1374_p6 = scmp.ne.s32.totalorder %s1725_s29, %s1373_s27  ;;  %p1380_p1 = scmp.lt.u32.totalorder %s1378_s21, %s1373_s27 }
  0x59   : > { %p1382_p5 = scmp.lt.u32.totalorder %s1373_s27, %s1725_s29 }
  0x5a   : > { %p1376_p11 = pnand %p1375_p10, %p1374_p6  ;;  %p1381_p3 = por %p1380_p1, %p1379_p0 }
  0x5c   : > { %p1377_p13 = pneg %p1376_p11  ;;  %p1383_p7 = por %p1382_p5, %p1381_p3 }
  0x5e   : > { %p1384_p2 = pnand %p1383_p7, %p1377_p13 }
  0x60   : > { %1387 = shalt.err (!%p1384_p2)
}
  0x61   : > { %s1388_s24 = scalar_lea.vmem %s1720_s11, 2048  ;;  %s1532_s12 = smov [#allocation6]  }
  0x62   : > { %p1389_p6 = scmp.ne.s32.totalorder %s1720_s11, %s1388_s24  ;;  %s1393_s1 = sshll.u32 %s1532_s12, 4  ;;  %s1394_s1 = int_to_ptr.vmem [resolvable:$false] %s1393_s1 }
  0x63   : > { %s1395_s30 = scalar_lea.vmem %s1394_s1, 4096  ;;  %p1396_p8 = scmp.lt.s32.totalorder %s1720_s11, %s1394_s1 }
  0x64   : > { %p1391_p11 = pnand %p1389_p6, %p1375_p10  ;;  %p1397_p0 = scmp.lt.s32.totalorder %s1395_s30, %s1388_s24 }
  0x66   : > { %p1392_p12 = pneg %p1391_p11  ;;  %p1398_p1 = por %p1397_p0, %p1396_p8 }
  0x68   : > { %p1399_p3 = pnand %p1398_p1, %p1392_p12 }
  0x6a   : > { %1402 = shalt.err (!%p1399_p3)
}
  0x6b   : > { %s1533_s27 = smov 128   ;;  %s1534_s21 = smov 8  }
  0x6c   : > { %1185 = dma.hbm_to_vmem [thread:$0]  (!%p1705_p4), %s1725_s29, 2048, %s1720_s11, %s1727_s0, %s1533_s27, %s1533_s27, %s1534_s21  }
  0x6d   : > { %366 = sbr.rel (%p1716_p9) target bundleno = 684 (0x2ac), region = 36  ;;  %s368_s22 = sand.u32 (!%p1716_p9), 1, %s1503_s17  }
  0x6e   : > { %s1104_s26 = sshll.u32 (!%p1716_p9), %s368_s22, 7  ;;  %s369_s12 = scalar_lea.sflag (!%p1716_p9), [#allocation7], %s368_s22 }
  0x6f   : > { %s1758_s24 = scalar_lea.vmem (!%p1716_p9), [#allocation6], %s1104_s26  ;;  %p1971_p8 = scmp.ne.s32.totalorder (!%p1716_p9), %s1963_s25, 0 }
  0x74   : > { %1478 = dma.done.wait (%p1971_p8), %s369_s12, 2048  }
  0x75   : > { %1480 = vsyncadd (%p1971_p8), %s369_s12, 4294965248  ;;  %s435_s9 = sshra.s32 %s1511_s19, 7  ;;  %s440_s11 = sand.u32 127, %s1511_s19 }
  0x76   : > { %s437_s13 = sadd.s32 %s1515_s20, %s435_s9  ;;  %s1952_s29 = sand.u32 1, %s1491_s2  }
  0x77   : > { %s1106_s0 = sshll.u32 %s437_s13, 7  ;;  %s1105_s1 = sshll.u32 %s1952_s29, 3 }
  0x78   : > { %s1770_s30 = sadd.s32 %s1106_s0, %s440_s11  ;;  %s1791_s17 = scalar_lea.vmem [#allocation9], %s1105_s1 }
  0x79   : > { %s442_s27 = sld [smem:[#allocation3 + %s1770_s30]]  ;;  %p1114_p9 = scmp.ne.s32.totalorder %s1511_s19, 0 }
  0x7a   : > { %s464_s25 = sld [smem:[#allocation4 + %s1770_s30]]  ;;  %v1535_v0 = vmov (!%p1114_p9), 0.0  }
  0x7b   : > { %s483_s21 = sld [smem:[#allocation3 + %s1770_s30]]  ;;  %513 = vst [vmem:[%s1791_s17] sm:$0xff] (!%p1114_p9), %v1535_v0 }
  0x7f   : > { %s1107_s22 = sshll.u32 %s442_s27, 4 }
  0x80   : > { %p465_p12 = scmp.lt.s32.totalorder %s464_s25, 1  ;;  %p444_p2 = scmp.lt.s32.totalorder %s1107_s22, 31 }
  0x81   : > { %s1111_s26 = sshll.u32 %s483_s21, 4  ;;  %512 = sbr.rel (%p1114_p9) target bundleno = 136 (0x88), region = 44 }
  0x82   : > { %s1999_s25 = smov (!%p465_p12, %s464_s25), 1  ;;  %s2001_s22 = smov (!%p444_p2, %s1107_s22), 31 }
  0x83   : > { %s467_s13 = scalar_lea.vmem %s1940_s4, %s1999_s25  ;;  %p485_p4 = scmp.lt.s32.totalorder %s1111_s26, 31 }
  0x84   : > { %s1108_s11 = sshll.u32 %s2001_s22, 3 }
  0x85   : > { %s1784_s6 = scalar_lea.vmem %s1939_s3, %s1108_s11  ;;  %s2003_s26 = smov (!%p485_p4, %s1111_s26), 31 }
  0x86   : > { %s1155_s27 = sshll.u32 %s2003_s26, 3 }
  0x87   : > { %s1789_s21 = scalar_lea.vmem %s1941_s5, %s1155_s27 }
  0x88 PF: > { %v1289_v1 = vld [vmem:[%s1758_s24 + $0x4] ss:$8 sps:$4 sm:$0xff]   ;;  %v1291_v2 = vld [vmem:[%s1758_s24] ss:$8 sps:$4 sm:$0xff]   ;;  %v1536_v3 = vmov 0   ;;  %v805_v12 = vld [vmem:[%s1784_s6 + $0x10] sm:$0xff] }
  0x89   : > { %1287 = vset.pattern.permute.xlu0 %v1536_v3  ;;  %1288 = vset.pattern.permute.xlu1 %v1536_v3  ;;  %v1292_v4 = vld [vmem:[%s1758_s24 + $0x14] ss:$8 sps:$4 sm:$0xff]   ;;  %v1294_v5 = vld [vmem:[%s1758_s24 + $0x10] ss:$8 sps:$4 sm:$0xff]   ;;  %v1295_v6 = vld [vmem:[%s1758_s24 + $0x24] ss:$8 sps:$4 sm:$0xff]  }
  0x8a   : > { %706 = vmatprep.subr.bf16.mxu0 %v1289_v1  ;;  %1156 = vmatprep.subr.bf16.mxu1 %v1289_v1  ;;  %v1315_v7 = vld [vmem:[%s1789_s21 + $0x4] ss:$8 sps:$4 sm:$0xff]   ;;  %v1297_v9 = vld [vmem:[%s1758_s24 + $0x20] ss:$8 sps:$4 sm:$0xff]   ;;  %v1298_v10 = vld [vmem:[%s1758_s24 + $0x34] ss:$8 sps:$4 sm:$0xff]  }
  0x8b   : > { %707 = vmatpush1.bf16.xpose.msra.mxu0 %v1291_v2  ;;  %1164 = vmatpush1.bf16.xpose.msra.mxu1 %v1291_v2  ;;  %v1318_v8 = vld [vmem:[%s1789_s21 + $0x44] ss:$8 sps:$4 sm:$0xff]   ;;  %v1300_v13 = vld [vmem:[%s1758_s24 + $0x30] ss:$8 sps:$4 sm:$0xff]   ;;  %v1303_v19 = vld [vmem:[%s1758_s24 + $0x40] ss:$8 sps:$4 sm:$0xff]  }
  0x8c   : > { %708 = vmatprep.subr.bf16.mxu0 %v1292_v4  ;;  %1157 = vmatprep.subr.bf16.mxu1 %v1292_v4  ;;  %v803_v11 = vld [vmem:[%s1784_s6] sm:$0xff]  ;;  %v804_v14 = vld [vmem:[%s1784_s6 + $0x8] sm:$0xff]  ;;  %v806_v15 = vld [vmem:[%s1784_s6 + $0x18] sm:$0xff]  ;;  %s951_s19 = sld [smem:[#allocation5 + %s1770_s30]]  ;;  %s1150_s29 = sshll.u32 %s1515_s20, 7 }
  0x8d   : > { %738 = vmatprep.mubr.bf16.mxu0 %v1315_v7  ;;  %770 = vmatprep.mubr.bf16.mxu1 %v1318_v8  ;;  %v1301_v16 = vld [vmem:[%s1758_s24 + $0x44] ss:$8 sps:$4 sm:$0xff]   ;;  %v809_v20 = vld [vmem:[%s1784_s6 + $0x30] sm:$0xff]  ;;  %v810_v21 = vld [vmem:[%s1784_s6 + $0x38] sm:$0xff]  ;;  %s972_s25 = sshll.u32 %s1791_s17, 4  ;;  %s1873_s12 = scalar_lea.hbm %s1943_s7, %s1150_s29  ;;  %s1875_s25 = int_to_ptr.vmem [resolvable:$true] %s972_s25 }
  0x8e   : > { %821 = vperm.xlu0 %1287, %v803_v11   ;;  %827 = vperm.xlu1 %1288, %v805_v12   ;;  %v807_v17 = vld [vmem:[%s1784_s6 + $0x20] sm:$0xff]  ;;  %v808_v18 = vld [vmem:[%s1784_s6 + $0x28] sm:$0xff]  ;;  %v1304_v22 = vld [vmem:[%s1758_s24 + $0x54] ss:$8 sps:$4 sm:$0xff]   ;;  %s1972_s30 = sand.u32 1, %s1491_s2   ;;  %p1973_p13 = scmp.ne.s32.totalorder %s1964_s10, 0 }
  0x8f   : > { %v811_v23 = vld [vmem:[%s1784_s6 + $0x40] sm:$0xff]  ;;  %v812_v24 = vld [vmem:[%s1784_s6 + $0x48] sm:$0xff]  ;;  %v1306_v25 = vld [vmem:[%s1758_s24 + $0x50] ss:$8 sps:$4 sm:$0xff]   ;;  %s959_s9 = scalar_lea.sflag [#allocation8], %s1972_s30  ;;  %s1537_s20 = smov [#allocation9]  }
  0x90   : > { %v813_v26 = vld [vmem:[%s1784_s6 + $0x50] sm:$0xff]  ;;  %v814_v27 = vld [vmem:[%s1784_s6 + $0x58] sm:$0xff]  ;;  %v1307_v28 = vld [vmem:[%s1758_s24 + $0x64] ss:$8 sps:$4 sm:$0xff]   ;;  %s1407_s11 = sshll.u32 %s1537_s20, 4  ;;  %s1408_s11 = int_to_ptr.vmem [resolvable:$false] %s1407_s11 }
  0x91   : > { %v815_v29 = vld [vmem:[%s1784_s6 + $0x60] sm:$0xff]  ;;  %v816_v30 = vld [vmem:[%s1784_s6 + $0x68] sm:$0xff]  ;;  %v817_v32 = vld [vmem:[%s1784_s6 + $0x70] sm:$0xff]  ;;  %s1409_s0 = scalar_lea.vmem %s1408_s11, 256  ;;  %p1410_p6 = scmp.lt.s32.totalorder %s1875_s25, %s1408_s11 }
  0x92   : > { %824 = vperm.xlu0 %1287, %v804_v14   ;;  %830 = vperm.xlu1 %1288, %v806_v15   ;;  %v1309_v31 = vld [vmem:[%s1758_s24 + $0x60] ss:$8 sps:$4 sm:$0xff]   ;;  %v818_v33 = vld [vmem:[%s1784_s6 + $0x78] sm:$0xff]  ;;  %v1325_v42 = vld [vmem:[%s1789_s21 + $0x24] ss:$8 sps:$4 sm:$0xff]   ;;  %s952_s8 = scvt.s32.f32 %s951_s19 }
  0x93   : > { %709 = vmatpush1.bf16.xpose.msra.mxu0 %v1294_v5  ;;  %1165 = vmatpush1.bf16.xpose.msra.mxu1 %v1294_v5  ;;  %v1310_v34 = vld [vmem:[%s1758_s24 + $0x74] ss:$8 sps:$4 sm:$0xff]   ;;  %v1312_v35 = vld [vmem:[%s1758_s24 + $0x70] ss:$8 sps:$4 sm:$0xff]   ;;  %v1313_v36 = vld [vmem:[%s1789_s21] ss:$8 sps:$4 sm:$0xff]  }
  0x94   : > { %710 = vmatprep.subr.bf16.mxu0 %v1295_v6  ;;  %1158 = vmatprep.subr.bf16.mxu1 %v1295_v6  ;;  %v1316_v37 = vld [vmem:[%s1789_s21 + $0x40] ss:$8 sps:$4 sm:$0xff]   ;;  %v1319_v38 = vld [vmem:[%s1789_s21 + $0x14] ss:$8 sps:$4 sm:$0xff]   ;;  %v1323_v40 = vld [vmem:[%s1789_s21 + $0x10] ss:$8 sps:$4 sm:$0xff]  }
  0x95   : > { %v1321_v39 = vld [vmem:[%s1789_s21 + $0x54] ss:$8 sps:$4 sm:$0xff]   ;;  %v1324_v41 = vld [vmem:[%s1789_s21 + $0x50] ss:$8 sps:$4 sm:$0xff]   ;;  %v1327_v43 = vld [vmem:[%s1789_s21 + $0x64] ss:$8 sps:$4 sm:$0xff]  }
  0x96   : > { %833 = vperm.xlu0 %1287, %v807_v17   ;;  %836 = vperm.xlu1 %1288, %v808_v18   ;;  %v1329_v44 = vld [vmem:[%s1789_s21 + $0x20] ss:$8 sps:$4 sm:$0xff]   ;;  %v1331_v46 = vld [vmem:[%s1789_s21 + $0x34] ss:$8 sps:$4 sm:$0xff]   ;;  %v1335_v48 = vld [vmem:[%s1789_s21 + $0x30] ss:$8 sps:$4 sm:$0xff]  }
  0x97   : > { %v1330_v45 = vld [vmem:[%s1789_s21 + $0x60] ss:$8 sps:$4 sm:$0xff]   ;;  %v1333_v47 = vld [vmem:[%s1789_s21 + $0x74] ss:$8 sps:$4 sm:$0xff]   ;;  %v1336_v49 = vld [vmem:[%s1789_s21 + $0x70] ss:$8 sps:$4 sm:$0xff]  }
  0x98   : > { %v1848_v53 = vld [vmem:[%s467_s13] ss:$0 sm:$0xff]  ;;  %s1403_s13 = scalar_lea.vmem %s1875_s25, 128 }
  0x99   : > { %p1404_p10 = scmp.ne.s32.totalorder %s1875_s25, %s1403_s13  ;;  %p1411_p11 = scmp.lt.s32.totalorder %s1409_s0, %s1403_s13 }
  0x9a   : > { %839 = vperm.xlu0 %1287, %v809_v20   ;;  %842 = vperm.xlu1 %1288, %v810_v21  }
  0x9b   : > { %711 = vmatpush1.bf16.xpose.msra.mxu0 %v1297_v9  ;;  %1166 = vmatpush1.bf16.xpose.msra.mxu1 %v1297_v9  ;;  %p1405_p5 = pnand %p1404_p10, %p1973_p13  ;;  %p1412_p0 = por %p1411_p11, %p1410_p6 }
  0x9c   : > { %712 = vmatprep.subr.bf16.mxu0 %v1298_v10  ;;  %1159 = vmatprep.subr.bf16.mxu1 %v1298_v10 }
  0x9d   : > { %p1406_p7 = pneg %p1405_p5 }
  0x9e   : > { %845 = vperm.xlu0 %1287, %v811_v23   ;;  %848 = vperm.xlu1 %1288, %v812_v24  }
  0x9f   : > { %p1413_p1 = pnand %p1412_p0, %p1406_p7 }
  0xa2   : > { %851 = vperm.xlu0 %1287, %v813_v26   ;;  %854 = vperm.xlu1 %1288, %v814_v27  }
  0xa3   : > { %713 = vmatpush1.bf16.xpose.msra.mxu0 %v1300_v13  ;;  %1167 = vmatpush1.bf16.xpose.msra.mxu1 %v1300_v13 }
  0xa4   : > { %714 = vmatprep.subr.bf16.mxu0 %v1301_v16  ;;  %1160 = vmatprep.subr.bf16.mxu1 %v1301_v16 }
  0xa6   : > { %857 = vperm.xlu0 %1287, %v815_v29   ;;  %860 = vperm.xlu1 %1288, %v816_v30  }
  0xaa   : > { %863 = vperm.xlu0 %1287, %v817_v32   ;;  %866 = vperm.xlu1 %1288, %v818_v33  }
  0xab   : > { %715 = vmatpush1.bf16.xpose.msra.mxu0 %v1303_v19  ;;  %1168 = vmatpush1.bf16.xpose.msra.mxu1 %v1303_v19 }
  0xac   : > { %716 = vmatprep.subr.bf16.mxu0 %v1304_v22  ;;  %1161 = vmatprep.subr.bf16.mxu1 %v1304_v22 }
  0xb3   : > { %717 = vmatpush1.bf16.xpose.msra.mxu0 %v1306_v25  ;;  %1169 = vmatpush1.bf16.xpose.msra.mxu1 %v1306_v25 }
  0xb4   : > { %718 = vmatprep.subr.bf16.mxu0 %v1307_v28  ;;  %1162 = vmatprep.subr.bf16.mxu1 %v1307_v28 }
  0xbb   : > { %719 = vmatpush1.bf16.xpose.msra.mxu0 %v1309_v31  ;;  %1170 = vmatpush1.bf16.xpose.msra.mxu1 %v1309_v31 }
  0xbc   : > { %720 = vmatprep.subr.bf16.mxu0 %v1310_v34  ;;  %1163 = vmatprep.subr.bf16.mxu1 %v1310_v34 }
  0xc3   : > { %721 = vmatpush1.bf16.xpose.msra.mxu0 %v1312_v35  ;;  %1171 = vmatpush1.bf16.xpose.msra.mxu1 %v1312_v35 }
  0xca   : > { %739 = vmatmul.mubr.bf16.vlgmr.msra.gmra.mrb[0].mxu0 %v1313_v36  ;;  %771 = vmatmul.mubr.bf16.vlgmr.msra.gmra.mrb[0].mxu1 %v1316_v37 }
  0xcb   : > { %746 = vmatprep.mubr.bf16.mxu0 %v1319_v38  ;;  %778 = vmatprep.mubr.bf16.mxu1 %v1321_v39 }
  0xd2   : > { %747 = vmatmul.mubr.bf16.gmra.mrb[4].mxu0 %v1323_v40  ;;  %779 = vmatmul.mubr.bf16.gmra.mrb[4].mxu1 %v1324_v41 }
  0xd3   : > { %754 = vmatprep.mubr.bf16.mxu0 %v1325_v42  ;;  %786 = vmatprep.mubr.bf16.mxu1 %v1327_v43 }
  0xda   : > { %755 = vmatmul.mubr.bf16.gmra.mrb[8].mxu0 %v1329_v44  ;;  %787 = vmatmul.mubr.bf16.gmra.mrb[8].mxu1 %v1330_v45 }
  0xdb   : > { %762 = vmatprep.mubr.bf16.mxu0 %v1331_v46  ;;  %794 = vmatprep.mubr.bf16.mxu1 %v1333_v47 }
  0xe2   : > { %763 = vmatmul.mubr.bf16.gmra.mrb[12].mxu0 %v1335_v48  ;;  %795 = vmatmul.mubr.bf16.gmra.mrb[12].mxu1 %v1336_v49 }
 0x10d   : > { %v822_v50 = vpop.permute.xlu0 %821  ;;  %v828_v51 = vpop.permute.xlu1 %827 }
 0x10e   : > { %vm872_vm0 = vcmp.ne.s32.totalorder %v822_v50, %v1848_v53  ;;  %vm874_vm2 = vcmp.ne.s32.totalorder %v828_v51, %v1848_v53 }
 0x111   : > { %v825_v52 = vpop.permute.xlu0 %824  ;;  %v831_v54 = vpop.permute.xlu1 %830 }
 0x112   : > { %vm873_vm1 = vcmp.ne.s32.totalorder %v825_v52, %v1848_v53  ;;  %vm875_vm3 = vcmp.ne.s32.totalorder %v831_v54, %v1848_v53 }
 0x115   : > { %v834_v55 = vpop.permute.xlu0 %833  ;;  %v837_v5 = vpop.permute.xlu1 %836 }
 0x116   : > { %vm876_vm4 = vcmp.ne.s32.totalorder %v834_v55, %v1848_v53  ;;  %vm877_vm5 = vcmp.ne.s32.totalorder %v837_v5, %v1848_v53 }
 0x119   : > { %v840_v6 = vpop.permute.xlu0 %839  ;;  %v843_v21 = vpop.permute.xlu1 %842 }
 0x11a   : > { %vm878_vm6 = vcmp.ne.s32.totalorder %v840_v6, %v1848_v53  ;;  %vm879_vm7 = vcmp.ne.s32.totalorder %v843_v21, %v1848_v53 }
 0x11d   : > { %v846_v22 = vpop.permute.xlu0 %845  ;;  %v849_v37 = vpop.permute.xlu1 %848 }
 0x11e   : > { %vm880_vm8 = vcmp.ne.s32.totalorder %v846_v22, %v1848_v53  ;;  %vm881_vm9 = vcmp.ne.s32.totalorder %v849_v37, %v1848_v53 }
 0x121   : > { %v852_v38 = vpop.permute.xlu0 %851  ;;  %v855_v52 = vpop.permute.xlu1 %854 }
 0x122   : > { %vm882_vm10 = vcmp.ne.s32.totalorder %v852_v38, %v1848_v53  ;;  %vm883_vm11 = vcmp.ne.s32.totalorder %v855_v52, %v1848_v53 }
 0x19d   : > { %v740_v56 = vpop.f32.mrb[0].mxu0  ;;  %v772_v57 = vpop.f32.mrb[0].mxu1 }
 0x19e   : > { %v888_v58 = vmul.f32 %v740_v56, %v740_v56  ;;  %v742_v59 = vpop.f32.mrb[1].mxu0  ;;  %v774_v60 = vpop.f32.mrb[1].mxu1  ;;  %v896_v46 = vmul.f32 %v772_v57, %v772_v57 }
 0x19f   : > { %v743_v61 = vpop.f32.mrb[2].mxu0  ;;  %v775_v62 = vpop.f32.mrb[2].mxu1 }
 0x1a0   : > { %v889_v63 = vmul.f32 %v743_v61, %v743_v61  ;;  %v745_v0 = vpop.f32.mrb[3].mxu0  ;;  %v777_v1 = vpop.f32.mrb[3].mxu1  ;;  %v904_v2 = vsel %vm872_vm0, %v888_v58, 0.0  ;;  %v897_v54 = vmul.f32 %v775_v62, %v775_v62  ;;  %v912_v58 = vsel %vm880_vm8, %v896_v46, 0.0 }
 0x1a1   : > { %v858_v60 = vpop.permute.xlu0 %857 }
 0x1a2   : > { %v905_v3 = vsel %vm873_vm1, %v889_v63, 0.0  ;;  %v913_v61 = vsel %vm881_vm9, %v897_v54, 0.0  ;;  %vm884_vm12 = vcmp.ne.s32.totalorder %v858_v60, %v1848_v53 }
 0x1a3   : > { %v920_v4 = vadd.f32 %v905_v3, %v904_v2  ;;  %v861_v2 = vpop.permute.xlu1 %860 }
 0x1a4   : > { %vm885_vm13 = vcmp.ne.s32.totalorder %v861_v2, %v1848_v53 }
 0x1a5   : > { %v748_v7 = vpop.f32.mrb[4].mxu0  ;;  %v780_v8 = vpop.f32.mrb[4].mxu1 }
 0x1a6   : > { %v890_v9 = vmul.f32 %v748_v7, %v748_v7  ;;  %v750_v10 = vpop.f32.mrb[5].mxu0  ;;  %v782_v11 = vpop.f32.mrb[5].mxu1  ;;  %v898_v59 = vmul.f32 %v780_v8, %v780_v8 }
 0x1a7   : > { %v751_v12 = vpop.f32.mrb[6].mxu0  ;;  %v783_v13 = vpop.f32.mrb[6].mxu1 }
 0x1a8   : > { %v906_v14 = vsel %vm874_vm2, %v890_v9, 0.0  ;;  %v891_v15 = vmul.f32 %v751_v12, %v751_v12  ;;  %v753_v16 = vpop.f32.mrb[7].mxu0  ;;  %v785_v17 = vpop.f32.mrb[7].mxu1  ;;  %v899_v63 = vmul.f32 %v783_v13, %v783_v13  ;;  %v914_v1 = vsel %vm882_vm10, %v898_v59, 0.0 }
 0x1a9   : > { %v921_v18 = vadd.f32 %v920_v4, %v906_v14  ;;  %v864_v7 = vpop.permute.xlu0 %863  ;;  %v867_v11 = vpop.permute.xlu1 %866 }
 0x1aa   : > { %v907_v19 = vsel %vm875_vm3, %v891_v15, 0.0  ;;  %v915_v62 = vsel %vm883_vm11, %v899_v63, 0.0  ;;  %vm886_vm14 = vcmp.ne.s32.totalorder %v864_v7, %v1848_v53  ;;  %vm887_vm15 = vcmp.ne.s32.totalorder %v867_v11, %v1848_v53  ;;  %v953_v53 = vld [vmem:[%s1791_s17] sm:$0xff] }
 0x1ab   : > { %v922_v20 = vadd.f32 %v921_v18, %v907_v19 }
 0x1ad   : > { %v756_v23 = vpop.f32.mrb[8].mxu0  ;;  %v788_v24 = vpop.f32.mrb[8].mxu1 }
 0x1ae   : > { %v892_v25 = vmul.f32 %v756_v23, %v756_v23  ;;  %v758_v26 = vpop.f32.mrb[9].mxu0  ;;  %v790_v27 = vpop.f32.mrb[9].mxu1  ;;  %v900_v3 = vmul.f32 %v788_v24, %v788_v24 }
 0x1af   : > { %v759_v28 = vpop.f32.mrb[10].mxu0  ;;  %v791_v29 = vpop.f32.mrb[10].mxu1 }
 0x1b0   : > { %v908_v30 = vsel %vm876_vm4, %v892_v25, 0.0  ;;  %v893_v31 = vmul.f32 %v759_v28, %v759_v28  ;;  %v761_v32 = vpop.f32.mrb[11].mxu0  ;;  %v793_v33 = vpop.f32.mrb[11].mxu1  ;;  %v901_v5 = vmul.f32 %v791_v29, %v791_v29  ;;  %v916_v8 = vsel %vm884_vm12, %v900_v3, 0.0 }
 0x1b1   : > { %v923_v34 = vadd.f32 %v922_v20, %v908_v30 }
 0x1b2   : > { %v909_v35 = vsel %vm877_vm5, %v893_v31, 0.0  ;;  %v917_v12 = vsel %vm885_vm13, %v901_v5, 0.0 }
 0x1b3   : > { %v924_v36 = vadd.f32 %v923_v34, %v909_v35 }
 0x1b5   : > { %v764_v39 = vpop.f32.mrb[12].mxu0  ;;  %v796_v40 = vpop.f32.mrb[12].mxu1 }
 0x1b6   : > { %v894_v41 = vmul.f32 %v764_v39, %v764_v39  ;;  %v766_v42 = vpop.f32.mrb[13].mxu0  ;;  %v798_v43 = vpop.f32.mrb[13].mxu1  ;;  %v902_v9 = vmul.f32 %v796_v40, %v796_v40 }
 0x1b7   : > { %v767_v44 = vpop.f32.mrb[14].mxu0  ;;  %v799_v45 = vpop.f32.mrb[14].mxu1 }
 0x1b8   : > { %v910_v47 = vsel %vm878_vm6, %v894_v41, 0.0  ;;  %v895_v48 = vmul.f32 %v767_v44, %v767_v44  ;;  %v769_v49 = vpop.f32.mrb[15].mxu0  ;;  %v801_v50 = vpop.f32.mrb[15].mxu1  ;;  %v903_v13 = vmul.f32 %v799_v45, %v799_v45  ;;  %v918_v15 = vsel %vm886_vm14, %v902_v9, 0.0 }
 0x1b9   : > { %v925_v51 = vadd.f32 %v924_v36, %v910_v47 }
 0x1ba   : > { %v911_v55 = vsel %vm879_vm7, %v895_v48, 0.0  ;;  %v919_v17 = vsel %vm887_vm15, %v903_v13, 0.0 }
 0x1bb   : > { %v926_v56 = vadd.f32 %v925_v51, %v911_v55 }
 0x1bd   : > { %v927_v57 = vadd.f32 %v926_v56, %v912_v58 }
 0x1bf   : > { %v928_v0 = vadd.f32 %v927_v57, %v913_v61 }
 0x1c1   : > { %v929_v4 = vadd.f32 %v928_v0, %v914_v1 }
 0x1c3   : > { %v930_v6 = vadd.f32 %v929_v4, %v915_v62 }
 0x1c5   : > { %v931_v10 = vadd.f32 %v930_v6, %v916_v8 }
 0x1c7   : > { %v932_v14 = vadd.f32 %v931_v10, %v917_v12 }
 0x1c9   : > { %v933_v16 = vadd.f32 %v932_v14, %v918_v15 }
 0x1cb   : > { %v934_v18 = vadd.f32 %v933_v16, %v919_v17 }
 0x1cd   : > { %935 = vadd.xlane.f32.xlu0 %v934_v18 }
 0x25a   : > { %v936_v19 = vpop.xlane.xlu0 %935 }
 0x25b   : > { %v937_v20 = vrot.slane %v936_v19, 4 }
 0x25d   : > { %v938_v21 = vadd.f32 %v937_v20, %v936_v19 }
 0x25f   : > { %v939_v22 = vrot.slane %v938_v21, 2 }
 0x261   : > { %v940_v23 = vadd.f32 %v939_v22, %v938_v21 }
 0x263   : > { %v941_v24 = vrot.slane %v940_v23, 1 }
 0x265   : > { %v942_v25 = vadd.f32 %v941_v24, %v940_v23 }
 0x267   : > { %1172 = vpush %v942_v25 }
 0x298   : > { %s1173_s24 = spop %1172 }
 0x299   : > { %s954_s1 = smul.f32 %s1173_s24, %s952_s8 }
 0x29b   : > { %v955_v26 = vstv %s954_s1 }
 0x29c   : > { %v956_v27 = vadd.f32 %v955_v26, %v953_v53 }
 0x29e   : > { %957 = vst [vmem:[%s1791_s17] sm:$0xff] %v956_v27 }
 0x29f   : > { %1416 = shalt.err (!%p1413_p1)
}
 0x2a0   : > { %s1417_s17 = scalar_lea.hbm %s1873_s12, 128  ;;  %s1421_s6 = scalar_lea.hbm %s1943_s7, 256 }
 0x2a1   : > { %p1418_p3 = scmp.ne.s32.totalorder %s1873_s12, %s1417_s17  ;;  %p1422_p2 = scmp.lt.u32.totalorder %s1873_s12, %s1943_s7 }
 0x2a2   : > { %p1423_p4 = scmp.lt.u32.totalorder %s1421_s6, %s1417_s17  ;;  %p1425_p10 = scmp.lt.u32.totalorder %s1417_s17, %s1873_s12 }
 0x2a3   : > { %p1419_p8 = pnand %p1418_p3, %p1973_p13 }
 0x2a4   : > { %p1424_p9 = por %p1423_p4, %p1422_p2 }
 0x2a5   : > { %p1420_p12 = pneg %p1419_p8 }
 0x2a6   : > { %p1426_p5 = por %p1425_p10, %p1424_p9 }
 0x2a8   : > { %p1427_p7 = pnand %p1426_p5, %p1420_p12 }
 0x2aa   : > { %1430 = shalt.err (!%p1427_p7)
}
 0x2ab   : > { %1178 = dma.vmem_to_hbm [thread:$0]  (%p1973_p13), %s1875_s25, 128, %s1873_s12, %s959_s9  }
 0x2ac PF: > { %p1191_p6 = scmp.ge.s32.totalorder %s1527_s23, 2  ;;  %s984_s8 = sand.u32 1, %s1487_s14  }
 0x2ad   : > { %p1974_p11 = scmp.ne.s32.totalorder %s1966_s28, 0  ;;  %s985_s24 = scalar_lea.sflag [#allocation8], %s984_s8 }
 0x2af   : > { %p1187_p0 = pnand %p1191_p6, %p1974_p11 }
 0x2b1   : > { %1482 = dma.done.wait (!%p1187_p0), %s985_s24, 128  }
 0x2b2   : > { %1484 = vsyncadd (!%p1187_p0), %s985_s24, 4294967168  ;;  %s37_s23 = sadd.s32 1, %s1527_s23   ;;  %s1975_s10 = sld [smem:[#allocation15_spill]] }
 0x2b3   : > { %p34_p1 = scmp.ge.s32.totalorder %s37_s23, 6   ;;  %s1976_s17 = sld [smem:[#allocation16_spill]] }
 0x2b4   : > { %s1977_s18 = sld [smem:[#allocation21_spill]]  ;;  %s1978_s19 = sld [smem:[#allocation17_spill]] }
 0x2b5   : > { %s1979_s20 = sld [smem:[#allocation18_spill]]  ;;  %s1980_s21 = sld [smem:[#allocation19_spill]] }
 0x2b6   : > { %s1981_s22 = sld [smem:[#allocation20_spill]]  ;;  %s1982_s14 = smov %s1491_s2 }
 0x2b7   : > { %s1983_s2 = smov %s1495_s15  ;;  %s1984_s15 = smov %s1684_s16 }
 0x2b8   : > { %s1985_s16 = smov %s1975_s10  ;;  %36 = sbr.rel (!%p34_p1) target bundleno = 45 (0x2d), region = 94 }
 0x2bf   :  { %990 = vsyncpa [#allocation7], 1 }
 0x2c0   :  { %992 = vsyncpa [#allocation7 + $0x1], 1 }
 0x2c1   :  { %993 = vsyncpa [#allocation8], 1 }
 0x2c2   :  { %995 = vsyncpa [#allocation8 + $0x1], 1 }

</bundles_post_ra>
